<compile_context>
chip_gen: v7x
topology: tpu7x:2x2x1
jax: 0.10.0
libtpu: 0.0.40
codegen_flags: <defaults>
</compile_context>

<pallas_src>
import jax
import jax.numpy as jnp
from jax.experimental import pallas as pl
from jax.experimental.pallas import tpu as pltpu


def _simdecoder_kernel(eps, mxu_dtype):
    def kernel(x_ref, w_ref, b_ref, o_ref):
        # x_ref: (C, TN) -- channels on sublanes, spatial positions on lanes.
        x = x_ref[...].astype(jnp.float32)
        # Channel LayerNorm (biased variance), single pass over the tile.
        m = jnp.mean(x, axis=0, keepdims=True)            # (1, TN)
        m2 = jnp.mean(x * x, axis=0, keepdims=True)       # (1, TN)
        var = jnp.maximum(m2 - m * m, 0.0)                # guard cancellation / garbage tail cols
        xn = (x - m) * jax.lax.rsqrt(var + eps)
        # gamma/beta already folded into w_ref/b_ref outside the kernel.
        # 1x1 conv == MXU matmul: (C_out, C) @ (C, TN) -> (C_out, TN), f32 accumulation.
        y = jnp.dot(w_ref[...], xn.astype(mxu_dtype),
                    preferred_element_type=jnp.float32)
        o_ref[...] = (y + b_ref[...]).astype(o_ref.dtype)

    return kernel


def _vmem_caps():
    """Generation-aware (spatial-tile budget, vmem_limit cap) in bytes."""
    phys = 128 << 20
    try:
        phys = int(pltpu.get_tpu_info().vmem_capacity_bytes)
    except Exception:
        pass
    if phys <= (64 << 20):
        # v7x-class: 64 MiB VMEM per TensorCore -> leave headroom for compiler scratch.
        return 20 << 20, 44 << 20
    # v5e / v6e: 128 MiB physical VMEM.
    return 56 << 20, 96 << 20


def _choose_spatial_tile(hw, C, C_out, x_bytes, o_bytes, w_bytes, budget_bytes):
    """Largest lane-aligned spatial tile keeping pipelined VMEM under budget."""
    if hw <= 2048:
        return hw                                    # full-extent block is always layout-legal
    # per-spatial-column VMEM: double-buffered in/out tiles + f32 temps (+ bf16 matmul copy)
    per_col = 2 * C * x_bytes + 2 * C_out * o_bytes + 4 * (2 * C + C_out) + C * w_bytes
    const = C_out * C * w_bytes + 4 * C_out + (1 << 20)  # single-buffered weight/bias + fudge
    tn = max(0, budget_bytes - const) // per_col
    tn = int(max(256, min(8192, (tn // 256) * 256)))     # DMA-chunk friendly multiple of 256
    tn = min(tn, ((hw + 255) // 256) * 256)              # don't over-run the spatial extent
    return tn


def sim_decoder_forward(x_nchw, gamma, beta, conv_w, conv_b, encoder_stride,
                        eps=1e-6, spatial_tile=None, mxu_dtype=None):
    """x_nchw: (B, C, H, W).  Returns (B, 3, H*r, W*r), same as the PyTorch module.

    Inputs / conv weight may be f32 or bf16; LayerNorm is computed in f32, the
    matmul uses bf16 operands (native MXU path) iff x or conv_w is bf16, and the
    output dtype follows the input dtype.
    """
    B, C, H, W = x_nchw.shape
    r = encoder_stride
    C_out = r * r * 3
    if conv_w.ndim == 4:                      # torch Conv2d weight (C_out, C, 1, 1)
        conv_w = conv_w.reshape(conv_w.shape[0], conv_w.shape[1])
    assert conv_w.shape == (C_out, C), conv_w.shape

    HW = H * W
    out_dtype = x_nchw.dtype
    x3 = x_nchw.reshape(B, C, HW)             # free reshape, no data movement

    if mxu_dtype is None:
        mxu_dtype = (jnp.bfloat16
                     if (x_nchw.dtype == jnp.bfloat16 or conv_w.dtype == jnp.bfloat16)
                     else jnp.float32)

    # Fold the LayerNorm affine into the conv (exact algebra, done once outside).
    w_f32 = conv_w.astype(jnp.float32)
    w_fold = (w_f32 * gamma.astype(jnp.float32)[None, :]).astype(mxu_dtype)
    b_fold = (w_f32 @ beta.astype(jnp.float32)
              + conv_b.astype(jnp.float32)).reshape(C_out, 1).astype(jnp.float32)

    x_bytes = jnp.dtype(x_nchw.dtype).itemsize
    o_bytes = jnp.dtype(out_dtype).itemsize
    w_bytes = jnp.dtype(mxu_dtype).itemsize

    budget, vmem_cap = _vmem_caps()
    tn = spatial_tile
    if tn is None:
        tn = _choose_spatial_tile(HW, C, C_out, x_bytes, o_bytes, w_bytes, budget)
        if B == 1 and tn >= HW and HW >= 512:
            # Keep >= 2 grid steps so both v7x TensorCores get work; on 1-TC chips
            # the extra step costs ~0.35us, negligible.
            tn = max(256, (((HW + 1) // 2 + 255) // 256) * 256)
    n_sp = pl.cdiv(HW, tn)                    # partial tail tile handled by Pallas masking

    # Explicit VMEM budget: double-buffered in/out tiles, single-buffered weight/bias,
    # f32 compute temps (+ bf16 matmul operand copy).
    vmem_est = (2 * tn * (C * x_bytes + C_out * o_bytes)
                + (C * C_out * w_bytes + 4 * C_out)
                + tn * ((2 * C + C_out) * 4 + C * w_bytes))
    vmem_limit = int(min(max(2 * vmem_est + (8 << 20), 16 << 20), vmem_cap))

    def _const_spec(shape):
        idx = lambda b, j: (0, 0)
        try:
            # Loop-invariant operand: single buffer (saves a full weight copy of VMEM).
            return pl.BlockSpec(shape, idx, pipeline_mode=pl.Buffered(1))
        except TypeError:
            return pl.BlockSpec(shape, idx)

    y3 = pl.pallas_call(
        _simdecoder_kernel(eps, mxu_dtype),
        out_shape=jax.ShapeDtypeStruct((B, C_out, HW), out_dtype),
        grid_spec=pltpu.PrefetchScalarGridSpec(
            num_scalar_prefetch=0,
            grid=(B, n_sp),
            in_specs=[
                pl.BlockSpec((None, C, tn), lambda b, j: (b, 0, j)),   # x block (C, tn)
                _const_spec((C_out, C)),                               # folded conv weight
                _const_spec((C_out, 1)),                               # folded conv bias
            ],
            out_specs=pl.BlockSpec((None, C_out, tn), lambda b, j: (b, 0, j)),
        ),
        compiler_params=pltpu.CompilerParams(
            dimension_semantics=("parallel", "parallel"),
            vmem_limit_bytes=vmem_limit),
    )(x3, w_fold, b_fold)

    # PixelShuffle(r): (B, 3*r*r, H*W) -> (B, 3, H*r, W*r)
    # TODO(synk): for large r (C_out = 3*r^2 >= C, e.g. SimMIM r=32) this XLA
    # transpose is one extra HBM round-trip over the *largest* tensor.  Fusing it
    # into out_specs requires an in-kernel sublane<->lane interleave (relayout)
    # whose Mosaic lowering support is not guaranteed, so it is deliberately kept
    # as glue here rather than risking a lowering failure.
    y = y3.reshape(B, 3, r, r, H, W)
    y = jnp.transpose(y, (0, 1, 4, 2, 5, 3))   # (B, 3, H, r, W, r)
    return y.reshape(B, 3, H * r, W * r)


def sim_decoder_ref(x_nchw, gamma, beta, conv_w, conv_b, encoder_stride, eps=1e-6):
    """Pure-JAX reference mirroring the PyTorch forward exactly."""
    B, C, H, W = x_nchw.shape
    r = encoder_stride
    x = x_nchw.astype(jnp.float32)
    u = jnp.mean(x, axis=1, keepdims=True)
    s = jnp.mean((x - u) ** 2, axis=1, keepdims=True)
    xn = (x - u) / jnp.sqrt(s + eps)
    xn = gamma[None, :, None, None] * xn + beta[None, :, None, None]
    y = jnp.einsum('bchw,oc->bohw', xn, conv_w) + conv_b[None, :, None, None]
    y = y.reshape(B, 3, r, r, H, W)
    y = jnp.transpose(y, (0, 1, 4, 2, 5, 3))
    return y.reshape(B, 3, H * r, W * r)


if __name__ == "__main__":
    key = jax.random.PRNGKey(0)

    def run_case(B, C, H, W, r, dtype, tol, k):
        k_x, k_w, k_b, k_g, k_be = jax.random.split(k, 5)
        C_out = r * r * 3
        x = jax.random.normal(k_x, (B, C, H, W), jnp.float32)
        gamma = 1.0 + 0.1 * jax.random.normal(k_g, (C,), jnp.float32)
        beta = 0.1 * jax.random.normal(k_be, (C,), jnp.float32)
        conv_w = jax.random.normal(k_w, (C_out, C), jnp.float32) * 0.05
        conv_b = jax.random.normal(k_b, (C_out,), jnp.float32) * 0.01

        x_in = x.astype(dtype)
        w_in = conv_w.astype(dtype)
        out = jax.block_until_ready(
            sim_decoder_forward(x_in, gamma, beta, w_in, conv_b, r))
        ref = sim_decoder_ref(x_in.astype(jnp.float32), gamma, beta,
                              w_in.astype(jnp.float32), conv_b, r)
        assert out.shape == (B, 3, H * r, W * r), out.shape
        err = float(jnp.max(jnp.abs(out.astype(jnp.float32) - ref)))
        assert err <= tol, (B, C, H, W, r, str(dtype), err)

    k1, k2, k3, k4 = jax.random.split(key, 4)
    # 1) shapes consistent with the module: B=2, in_channel=16, 8x8 feature map, stride=2
    #    (non-trivial gamma/beta exercise the affine->conv fold).
    run_case(2, 16, 8, 8, 2, jnp.float32, 1e-4, k1)
    # 2) spatial extent not a multiple of 128 -> full-extent (unaligned) tile path.
    run_case(1, 32, 20, 20, 2, jnp.float32, 1e-4, k2)
    # 3) bf16 I/O + bf16 MXU operands (halved HBM traffic on this bandwidth-bound kernel).
    run_case(2, 16, 8, 8, 2, jnp.bfloat16, 1e-1, k3)
    # 4) HW > 2048 -> auto tile chooser, cdiv grid with masked tail tile, B=1 grid split.
    run_case(1, 16, 48, 48, 2, jnp.float32, 1e-4, k4)

    print("KERNEL_OK")
</pallas_src>

<mosaic_0001>
module attributes {stable_mosaic.version = 11 : i64} {
  func.func @kernel(%arg0: i32, %arg1: i32, %arg2: memref<1x16x64xf32, #tpu.memory_space<vmem>>, %arg3: memref<12x16xf32, #tpu.memory_space<vmem>>, %arg4: memref<12x1xf32, #tpu.memory_space<vmem>>, %arg5: memref<1x12x64xf32, #tpu.memory_space<vmem>>) attributes {dimension_semantics = [#tpu.dimension_semantics<parallel>, #tpu.dimension_semantics<parallel>], iteration_bounds = array<i64: 2, 1>, scalar_prefetch = 0 : i64, scratch_operands = 0 : i64, tpu.core_type = #tpu.core_type<tc>, window_params = [{transform_indices = @transform_0, window_bounds = array<i64: 1, 16, 64>}, {pipeline_mode = #tpu.pipeline_mode<synchronous>, transform_indices = @transform_1, window_bounds = array<i64: 12, 16>}, {pipeline_mode = #tpu.pipeline_mode<synchronous>, transform_indices = @transform_2, window_bounds = array<i64: 12, 1>}, {transform_indices = @transform_3, window_bounds = array<i64: 1, 12, 64>}]} {
    %c0 = arith.constant 0 : index
    %c0_0 = arith.constant 0 : index
    %c0_1 = arith.constant 0 : index
    %0 = vector.load %arg2[%c0, %c0_0, %c0_1] : memref<1x16x64xf32, #tpu.memory_space<vmem>>, vector<1x16x64xf32>
    %1 = vector.shape_cast %0 : vector<1x16x64xf32> to vector<16x64xf32>
    %cst = arith.constant dense<0.000000e+00> : vector<64xf32>
    %2 = vector.multi_reduction <add>, %1, %cst [0] : vector<16x64xf32> to vector<64xf32>
    %3 = vector.shape_cast %2 : vector<64xf32> to vector<1x64xf32>
    %cst_2 = arith.constant 1.600000e+01 : f32
    %4 = vector.broadcast %cst_2 : f32 to vector<1x64xf32>
    %5 = arith.divf %3, %4 : vector<1x64xf32>
    %6 = arith.mulf %1, %1 : vector<16x64xf32>
    %cst_3 = arith.constant dense<0.000000e+00> : vector<64xf32>
    %7 = vector.multi_reduction <add>, %6, %cst_3 [0] : vector<16x64xf32> to vector<64xf32>
    %8 = vector.shape_cast %7 : vector<64xf32> to vector<1x64xf32>
    %cst_4 = arith.constant 1.600000e+01 : f32
    %9 = vector.broadcast %cst_4 : f32 to vector<1x64xf32>
    %10 = arith.divf %8, %9 : vector<1x64xf32>
    %11 = arith.mulf %5, %5 : vector<1x64xf32>
    %12 = arith.subf %10, %11 : vector<1x64xf32>
    %cst_5 = arith.constant 0.000000e+00 : f32
    %13 = vector.broadcast %cst_5 : f32 to vector<1x64xf32>
    %14 = arith.maximumf %12, %13 : vector<1x64xf32>
    %15 = vector.broadcast %5 : vector<1x64xf32> to vector<16x64xf32>
    %16 = arith.subf %1, %15 : vector<16x64xf32>
    %cst_6 = arith.constant 9.99999997E-7 : f32
    %17 = vector.broadcast %cst_6 : f32 to vector<1x64xf32>
    %18 = arith.addf %14, %17 : vector<1x64xf32>
    %19 = math.rsqrt %18 : vector<1x64xf32>
    %20 = vector.broadcast %19 : vector<1x64xf32> to vector<16x64xf32>
    %21 = arith.mulf %16, %20 : vector<16x64xf32>
    %c0_7 = arith.constant 0 : index
    %c0_8 = arith.constant 0 : index
    %22 = vector.load %arg3[%c0_7, %c0_8] : memref<12x16xf32, #tpu.memory_space<vmem>>, vector<12x16xf32>
    %cst_9 = arith.constant dense<0.000000e+00> : vector<12x64xf32>
    %23 = tpu.matmul %22, %21, %cst_9 {dimension_numbers = #tpu.dot_dimension_numbers<[1], [0], [0], [1], [0, 0, 1, 1], [], []>} : vector<12x16xf32>, vector<16x64xf32>, vector<12x64xf32> -> vector<12x64xf32>
    %c0_10 = arith.constant 0 : index
    %c0_11 = arith.constant 0 : index
    %24 = vector.load %arg4[%c0_10, %c0_11] : memref<12x1xf32, #tpu.memory_space<vmem>>, vector<12x1xf32>
    %25 = vector.broadcast %24 : vector<12x1xf32> to vector<12x64xf32>
    %26 = arith.addf %23, %25 : vector<12x64xf32>
    %c0_12 = arith.constant 0 : index
    %c0_13 = arith.constant 0 : index
    %c0_14 = arith.constant 0 : index
    %27 = vector.load %arg5[%c0_12, %c0_13, %c0_14] : memref<1x12x64xf32, #tpu.memory_space<vmem>>, vector<1x12x64xf32>
    %28 = vector.shape_cast %27 : vector<1x12x64xf32> to vector<12x64xf32>
    %29 = vector.shape_cast %26 : vector<12x64xf32> to vector<1x12x64xf32>
    tpu.vector_store %arg5[%c0_12, %c0_13, %c0_14], %29 {strides = array<i32>} : memref<1x12x64xf32, #tpu.memory_space<vmem>>, vector<1x12x64xf32>,
    return
  }
  func.func @transform_0(%arg0: i32, %arg1: i32) -> (i32, i32, i32) {
    %c0_i32 = arith.constant 0 : i32
    %c0_i32_0 = arith.constant 0 : i32
    return %arg0, %c0_i32, %arg1 : i32, i32, i32
  }
  func.func @transform_1(%arg0: i32, %arg1: i32) -> (i32, i32) {
    %c0_i32 = arith.constant 0 : i32
    %c0_i32_0 = arith.constant 0 : i32
    %c0_i32_1 = arith.constant 0 : i32
    return %c0_i32, %c0_i32_0 : i32, i32
  }
  func.func @transform_2(%arg0: i32, %arg1: i32) -> (i32, i32) {
    %c0_i32 = arith.constant 0 : i32
    %c0_i32_0 = arith.constant 0 : i32
    %c0_i32_1 = arith.constant 0 : i32
    return %c0_i32, %c0_i32_0 : i32, i32
  }
  func.func @transform_3(%arg0: i32, %arg1: i32) -> (i32, i32, i32) {
    %c0_i32 = arith.constant 0 : i32
    %c0_i32_0 = arith.constant 0 : i32
    return %arg0, %c0_i32, %arg1 : i32, i32, i32
  }
}

</mosaic_0001>

<bundles_post_ra>
// kernel: tpu_custom_call.1
= control target key start
LH: loop header
LB: loop body
LE: loop exit
PB: predicated region body
PF: predicated region fallthrough
CT: control target
= control target key end

     0   :  { %8 = vsyncpa [#allocation3], 0  ;;  %s781_s0 = inlined_call_operand.hbm [shape: f32[2,16,64], index: 0, kind: input, shape index: {}]   ;;  %s782_s1 = inlined_call_operand.vmem [shape: f32[12,16], index: 1, kind: input, shape index: {}]   ;;  %s783_s2 = inlined_call_operand.vmem [shape: f32[12,1], index: 2, kind: input, shape index: {}]   ;;  %s784_s3 = inlined_call_operand.vmem [shape: f32[2,12,64], index: 3, kind: output, shape index: {}]  }
   0x1   :  { %10 = vsyncpa [#allocation3 + $0x1], 0  ;;  %s638_s12 = smov 0   ;;  %s640_s13 = smov 0  }
   0x2   :  { %s642_s14 = smov 0   ;;  %s644_s15 = smov 0  }
   0x3   :  { %s646_s16 = smov 0   ;;  %s648_s17 = smov 0  }
   0x4 LB: > { %s439_s18 = sadd.s32 4294967295, %s612_s17   ;;  %s28_s19 = sadd.s32 1, %s608_s16  ;;  %s612_s17 = sphi %s648_s17, %s16_s17   ;;  %s608_s16 = sphi %s646_s16, %s792_s16   ;;  %s604_s15 = sphi %s644_s15, %s791_s15   ;;  %s600_s14 = sphi %s642_s14, %s790_s14   ;;  %s596_s13 = sphi %s640_s13, %s789_s13   ;;  %s592_s12 = sphi %s638_s12, %s788_s12  }
   0x5   : > { %p30_p0 = scmp.ge.s32.totalorder %s28_s19, 2  ;;  %s37_s20 = sadd.s32 1, %s600_s14 }
   0x6   : > { %p44_p1 = scmp.ne.s32.totalorder %s600_s14, %s596_s13  ;;  %p45_p2 = scmp.eq.s32.totalorder %s612_s17, 0 }
   0x7   : > { %s794_s19 = smov (%p30_p0, %s28_s19), 0  ;;  %p50_p4 = scmp.ne.s32.totalorder %s596_s13, %s592_s12 }
   0x8   : > { %p674_p3 = por %p45_p2, %p44_p1  ;;  %s32_s22 = ssub.s32 %s608_s16, %s794_s19 }
   0x9   : > { %p51_p5 = scmp.eq.s32.totalorder %s439_s18, 0  ;;  %p35_p6 = scmp.eq.s32.totalorder %s32_s22, 0 }
   0xa   : > { %p477_p8 = scmp.lt.s32.totalorder %s612_s17, 2  ;;  %s150_s25 = sand.u32 1, %s600_s14  }
   0xb   : > { %p681_p7 = por %p51_p5, %p50_p4  ;;  %s454_s26 = sshll.u32 %s608_s16, 8 }
   0xc   : > { %s687_s24 = scalar_select %p35_p6, %s600_s14, %s37_s20  }
   0xd   : > { %s443_s27 = sshll.u32 %s150_s25, 4  ;;  %s694_s30 = scalar_lea.hbm %s781_s0, %s454_s26 }
   0xe   : > { %s154_s4 = scalar_lea.vmem [#allocation2], %s443_s27  ;;  %p698_p9 = pnand %p477_p8, %p674_p3 }
   0xf   : > { %s162_s5 = sshll.u32 %s154_s4, 4  ;;  %s704_s7 = scalar_lea.sflag [#allocation3], %s150_s25  ;;  %s702_s5 = int_to_ptr.vmem [resolvable:$true] %s162_s5 }
  0x10   : > { %s532_s8 = scalar_lea.hbm %s694_s30, 256  ;;  %p534_p11 = pneg %p698_p9 }
  0x11   : > { %p533_p10 = scmp.ne.s32.totalorder %s694_s30, %s532_s8  ;;  %s537_s11 = scalar_lea.hbm %s781_s0, 512 }
  0x12   : > { %p538_p0 = scmp.lt.u32.totalorder %s694_s30, %s781_s0  ;;  %p539_p1 = scmp.lt.u32.totalorder %s537_s11, %s532_s8 }
  0x13   : > { %p535_p12 = pnand %p534_p11, %p533_p10  ;;  %p541_p3 = scmp.lt.u32.totalorder %s532_s8, %s694_s30 }
  0x14   : > { %p540_p2 = por %p539_p1, %p538_p0 }
  0x15   : > { %p536_p13 = pneg %p535_p12 }
  0x16   : > { %p542_p4 = por %p541_p3, %p540_p2 }
  0x18   : > { %p543_p5 = pnand %p542_p4, %p536_p13 }
  0x1a   : > { %546 = shalt.err (!%p543_p5)
}
  0x1b   : > { %s547_s20 = scalar_lea.vmem %s702_s5, 256  ;;  %s614_s21 = smov [#allocation2]  }
  0x1c   : > { %p548_p6 = scmp.ne.s32.totalorder %s702_s5, %s547_s20  ;;  %s552_s22 = sshll.u32 %s614_s21, 4  ;;  %s553_s22 = int_to_ptr.vmem [resolvable:$false] %s552_s22 }
  0x1d   : > { %s554_s25 = scalar_lea.vmem %s553_s22, 512  ;;  %p555_p12 = scmp.lt.s32.totalorder %s702_s5, %s553_s22 }
  0x1e   : > { %p550_p8 = pnand %p548_p6, %p534_p11  ;;  %p556_p0 = scmp.lt.s32.totalorder %s554_s25, %s547_s20 }
  0x20   : > { %p551_p10 = pneg %p550_p8  ;;  %p557_p1 = por %p556_p0, %p555_p12 }
  0x22   : > { %p558_p2 = pnand %p557_p1, %p551_p10 }
  0x24   : > { %561 = shalt.err (!%p558_p2)
}
  0x25   : > { %s615_s26 = smov 128   ;;  %s616_s27 = smov 8  }
  0x26   : > { %476 = dma.hbm_to_vmem [thread:$0]  (!%p698_p9), %s694_s30, 256, %s702_s5, %s704_s7, %s615_s26, %s615_s26, %s616_s27  }
  0x27   : > { %p446_p11 = scmp.ge.s32.totalorder %s612_s17, 1  ;;  %p170_p13 = scmp.lt.s32.totalorder %s612_s17, 3 }
  0x29   : > { %p171_p3 = pnand %p446_p11, %p170_p13 }
  0x2a   : > { %s176_s28 = sand.u32 (!%p171_p3), 1, %s596_s13  }
  0x2b   : > { %174 = sbr.rel (%p171_p3) target bundleno = 312 (0x138), region = 32  ;;  %s447_s29 = sshll.u32 (!%p171_p3), %s176_s28, 4 }
  0x2c   : > { %s177_s4 = scalar_lea.sflag (!%p171_p3), [#allocation3], %s176_s28  ;;  %s180_s8 = scalar_lea.vmem (!%p171_p3), [#allocation2], %s447_s29 }
  0x32   : > { %587 = dma.done.wait (%p681_p7), %s177_s4, 256  }
  0x33   : > { %589 = vsyncadd (%p681_p7), %s177_s4, 4294967040  ;;  %v617_v0 = vmov 0   ;;  %vm216_vm0 = vcmask 523264   ;;  %vm263_vm1 = vcmask 130048   ;;  %v214_v1 = vld [vmem:[%s180_s8] sm:$0xff]  ;;  %v215_v2 = vld [vmem:[%s180_s8 + $0x8] sm:$0xff] }
  0x34   : > { %529 = vset.pattern.permute.xlu0 %v617_v0  ;;  %v249_v3 = vld [vmem:[%s782_s1] sm:$0xff]  ;;  %v217_v4 = vsel %vm216_vm0, %v214_v1, 0.0  ;;  %v218_v5 = vsel %vm216_vm0, %v215_v2, 0.0  ;;  %v228_v6 = vmul.f32 %v214_v1, %v214_v1  ;;  %v229_v7 = vmul.f32 %v215_v2, %v215_v2  ;;  %v252_v12 = vld [vmem:[%s783_s2 + $0x8] sm:$0xf]  ;;  %p206_p7 = scmp.lt.s32.totalorder %s604_s15, 1 }
  0x35   : > { %464 = vmatprep.mubr.msk.f32.mxu0 %vm263_vm1, %v249_v3  ;;  %v251_v8 = vld [vmem:[%s783_s2] sm:$0xff]  ;;  %v219_v9 = vadd.f32 %v218_v5, %v217_v4  ;;  %v250_v38 = vld [vmem:[%s782_s1 + $0x8] sm:$0xf]  ;;  %vm346_vm2 = vcmask 519168  }
  0x36   : > { %255 = vperm.xlu0 %529, %v251_v8   ;;  %v230_v10 = vsel %vm216_vm0, %v228_v6, 0.0  ;;  %v231_v11 = vsel %vm216_vm0, %v229_v7, 0.0  ;;  %s796_s15 = smov (!%p206_p7, %s604_s15), 1 }
  0x37   : > { %v220_v13 = vrot.slane %v219_v9, 4  ;;  %v232_v14 = vadd.f32 %v231_v11, %v230_v10  ;;  %s455_s12 = sshll.u32 %s796_s15, 4 }
  0x38   : > { %s213_s21 = scalar_lea.vmem %s784_s3, %s455_s12 }
  0x39   : > { %v221_v15 = vadd.f32 %v220_v13, %v219_v9  ;;  %v233_v16 = vrot.slane %v232_v14, 4 }
  0x3a   : > { %260 = vperm.xlu0 %529, %v252_v12  }
  0x3b   : > { %v222_v17 = vrot.slane %v221_v15, 2  ;;  %v234_v18 = vadd.f32 %v233_v16, %v232_v14 }
  0x3d   : > { %v223_v19 = vadd.f32 %v222_v17, %v221_v15  ;;  %v235_v20 = vrot.slane %v234_v18, 2 }
  0x3f   : > { %v224_v21 = vrot.slane %v223_v19, 1  ;;  %v236_v22 = vadd.f32 %v235_v20, %v234_v18 }
  0x41   : > { %v225_v23 = vadd.f32 %v224_v21, %v223_v19  ;;  %v237_v24 = vrot.slane %v236_v22, 1 }
  0x43   : > { %v227_v25 = vmul.f32 0.0625, %v225_v23  ;;  %v238_v26 = vadd.f32 %v237_v24, %v236_v22 }
  0x45   : > { %v239_v27 = vmul.f32 0.0625, %v238_v26  ;;  %v240_v28 = vmul.f32 %v227_v25, %v227_v25  ;;  %v243_v32 = vsub.f32 %v214_v1, %v227_v25  ;;  %v244_v33 = vsub.f32 %v215_v2, %v227_v25 }
  0x47   : > { %v241_v29 = vsub.f32 %v239_v27, %v240_v28 }
  0x49   : > { %v242_v30 = vmax.f32 %v241_v29, 0.0 }
  0x4b   : > { %v245_v31 = vadd.f32 1e-06, %v242_v30 }
  0x4d   : > { %530 = vrsqrt.f32 %v245_v31 }
  0x57   : > { %v531_v34 = vpop.eup %530 }
  0x58   : > { %v247_v35 = vmul.f32 %v531_v34, %v243_v32  ;;  %v248_v36 = vmul.f32 %v531_v34, %v244_v33 }
  0x5a   : > { %v467_v37 = vpack.c.bf16 %v248_v36, %v247_v35 }
  0x5c   : > { %468 = vmatprep.subr.bf16.mxu0 %v467_v37 }
  0x5d   : > { %470 = vmatpush3.bf16.msra.mxu0 %v467_v37 }
  0x60   : > { %465 = vmatmul.mubr.msk.f32.vlgmr.msra.gmra.mrb[0].mxu0 %vm263_vm1, %v250_v38 }
  0xb5   : > { %v256_v39 = vpop.permute.xlu0 %255 }
  0xb9   : > { %v261_v40 = vpop.permute.xlu0 %260 }
 0x133   : > { %v466_v41 = vpop.f32.mrb[0].mxu0 }
 0x134   : > { %v342_v42 = vadd.f32 %v466_v41, %v261_v40  ;;  %v336_v43 = vpop.f32.mrb[1].mxu0 }
 0x135   : > { %v337_v44 = vadd.f32 %v336_v43, %v256_v39 }
 0x136   : > { %347 = vst.msk [vmem:[%s213_s21 + $0x8] sm:$0xf] %vm346_vm2, %v342_v42 }
 0x137   : > { %345 = vst.msk [vmem:[%s213_s21] sm:$0xff] %vm216_vm0, %v337_v44 }
 0x138 PF: > { %s16_s17 = sadd.s32 1, %s612_s17   ;;  %s788_s12 = smov %s596_s13 }
 0x139   : > { %p13_p9 = scmp.ge.s32.totalorder %s16_s17, 4   ;;  %s789_s13 = smov %s600_s14 }
 0x13a   : > { %s790_s14 = smov %s687_s24  ;;  %s791_s15 = smov %s608_s16 }
 0x13b   : > { %s792_s16 = smov %s794_s19  ;;  %15 = sbr.rel (!%p13_p9) target bundleno = 4 (0x4), region = 72 }
 0x142   :  { %375 = vsyncpa [#allocation3], 1 }
 0x143   :  { %377 = vsyncpa [#allocation3 + $0x1], 1 }

</bundles_post_ra>
